<compile_context>
chip_gen: v6e
topology: v6e:2x2x1
jax: 0.10.0
libtpu: 0.0.40
codegen_flags: <defaults>
</compile_context>

<pallas_src>
import functools

import jax
import jax.numpy as jnp
from jax.experimental import pallas as pl
from jax.experimental.pallas import tpu as pltpu


def _dropout_threshold(p_drop: float) -> int:
    """keep iff uint32 bits >= round(p * 2**32)  (keep prob = 1 - p to within 2^-32)."""
    return min(int(round(float(p_drop) * (1 << 32))), (1 << 32) - 1)


def _disc_train_kernel(bits_ref, x1_ref, x2_ref, x3_ref, w_ref, b_ref,
                       o1_ref, o2_ref, o3_ref, *, p_drop):
    """Fused dropout + Linear over all three modalities in one invocation.

    bits_ref : VMEM u32[3B, F]   raw random bits for the dropout mask
    x*_ref   : VMEM f32[B, F]    the three modality inputs
    w_ref    : VMEM f32[F, M]    Linear weight (pre-transposed)
    b_ref    : VMEM f32[1, M]    Linear bias
    o*_ref   : VMEM f32[B, M]    per-modality outputs
    """
    B = x1_ref.shape[0]
    # Stack the three inputs into one [3B, F] slab in vregs (no extra HBM copy).
    x = jnp.concatenate([x1_ref[...], x2_ref[...], x3_ref[...]], axis=0)

    # Integer-domain inverted dropout: keep iff bits >= round(p * 2**32).
    thresh = jnp.uint32(_dropout_threshold(p_drop))
    keep = bits_ref[...] >= thresh
    scale = jnp.where(keep,
                      jnp.float32(1.0 / (1.0 - p_drop)),
                      jnp.float32(0.0))
    x = x * scale

    # One MXU matmul for all three modalities (24 rows fits a single push),
    # then a single broadcast bias add.
    y = jnp.dot(x, w_ref[...], preferred_element_type=jnp.float32) + b_ref[...]

    o1_ref[...] = y[:B].astype(o1_ref.dtype)
    o2_ref[...] = y[B:2 * B].astype(o2_ref.dtype)
    o3_ref[...] = y[2 * B:].astype(o3_ref.dtype)


def _disc_eval_kernel(x1_ref, x2_ref, x3_ref, w_ref, b_ref,
                      o1_ref, o2_ref, o3_ref):
    """Eval mode (dropout is identity): fused Linear over all three modalities."""
    B = x1_ref.shape[0]
    x = jnp.concatenate([x1_ref[...], x2_ref[...], x3_ref[...]], axis=0)
    y = jnp.dot(x, w_ref[...], preferred_element_type=jnp.float32) + b_ref[...]
    o1_ref[...] = y[:B].astype(o1_ref.dtype)
    o2_ref[...] = y[B:2 * B].astype(o2_ref.dtype)
    o3_ref[...] = y[2 * B:].astype(o3_ref.dtype)


def d_forward(x_audio1, x_audio2, x_image, w_t, b, *, p_drop,
              training=True, rng_key=None):
    """Forward pass of D: returns (audio1_logits, audio2_logits, image_logits)."""
    B, F = x_audio1.shape
    M = w_t.shape[1]
    use_dropout = bool(training) and float(p_drop) > 0.0

    vmem = pl.BlockSpec(memory_space=pltpu.MemorySpace.VMEM)
    out_shape = tuple(jax.ShapeDtypeStruct((B, M), jnp.float32) for _ in range(3))
    out_specs = (vmem, vmem, vmem)

    flops = 2 * 3 * B * F * M
    bytes_accessed = (3 * B * F + F * M + M + 3 * B * M) * 4
    if use_dropout:
        bytes_accessed += 3 * B * F * 4
    cost = pl.CostEstimate(flops=flops, transcendentals=0,
                           bytes_accessed=bytes_accessed)

    # NOTE: at these shapes everything (inputs, weight, bias, bits) is a few KB,
    # far under the 64 MiB v7x VMEM; no K-tiling / vmem_limit_bytes needed.
    # TODO(synk): add a K-tiled reduction grid axis if feats_cls/batch grow
    # enough that 3*B*F*4 + F*M*4 approaches the scoped-VMEM default.
    if use_dropout:
        if rng_key is None:
            rng_key = jax.random.PRNGKey(0)
        # One bits draw for all three modalities (single seed, single stream).
        bits = jax.random.bits(rng_key, (3 * B, F), dtype=jnp.uint32)
        kernel = functools.partial(_disc_train_kernel, p_drop=float(p_drop))
        o1, o2, o3 = pl.pallas_call(
            kernel,
            out_shape=out_shape,
            in_specs=[vmem] * 6,
            out_specs=out_specs,
            cost_estimate=cost,
        )(bits, x_audio1, x_audio2, x_image, w_t, b)
    else:
        o1, o2, o3 = pl.pallas_call(
            _disc_eval_kernel,
            out_shape=out_shape,
            in_specs=[vmem] * 5,
            out_specs=out_specs,
            cost_estimate=cost,
        )(x_audio1, x_audio2, x_image, w_t, b)
    return o1, o2, o3


if __name__ == "__main__":
    # Small shapes consistent with the module: three [batch, feats_cls] inputs.
    batch = 8
    feats_cls = 32
    num_modality = 4
    dropout_d1 = 0.3

    key = jax.random.PRNGKey(0)
    k_x1, k_x2, k_x3, k_w, k_b, k_drop = jax.random.split(key, 6)

    x1 = jax.random.normal(k_x1, (batch, feats_cls), dtype=jnp.float32)
    x2 = jax.random.normal(k_x2, (batch, feats_cls), dtype=jnp.float32)
    x3 = jax.random.normal(k_x3, (batch, feats_cls), dtype=jnp.float32)

    # PyTorch-style Linear init: uniform(-1/sqrt(fan_in), 1/sqrt(fan_in)).
    bound = 1.0 / (feats_cls ** 0.5)
    w = jax.random.uniform(k_w, (num_modality, feats_cls), jnp.float32, -bound, bound)
    b = jax.random.uniform(k_b, (1, num_modality), jnp.float32, -bound, bound)
    w_t = jnp.transpose(w)  # [feats_cls, num_modality]

    # --- Eval mode (dropout disabled): check against pure-JAX reference ------
    o1, o2, o3 = d_forward(x1, x2, x3, w_t, b, p_drop=dropout_d1, training=False)
    jax.block_until_ready((o1, o2, o3))
    assert jnp.allclose(o1, x1 @ w_t + b, atol=1e-5), "audio1 mismatch (eval)"
    assert jnp.allclose(o2, x2 @ w_t + b, atol=1e-5), "audio2 mismatch (eval)"
    assert jnp.allclose(o3, x3 @ w_t + b, atol=1e-5), "image mismatch (eval)"

    # --- Training mode (dropout fused in the kernel) --------------------------
    t1, t2, t3 = d_forward(x1, x2, x3, w_t, b, p_drop=dropout_d1,
                           training=True, rng_key=k_drop)
    jax.block_until_ready((t1, t2, t3))
    assert t1.shape == (batch, num_modality)
    assert t2.shape == (batch, num_modality)
    assert t3.shape == (batch, num_modality)

    # Reference training output using the same bit stream / threshold rule.
    bits_ref = jax.random.bits(k_drop, (3 * batch, feats_cls), dtype=jnp.uint32)
    thresh = jnp.uint32(_dropout_threshold(dropout_d1))
    scale_ref = jnp.where(bits_ref >= thresh,
                          jnp.float32(1.0 / (1.0 - dropout_d1)),
                          jnp.float32(0.0))
    x_cat = jnp.concatenate([x1, x2, x3], axis=0) * scale_ref
    y_ref = x_cat @ w_t + b
    assert jnp.allclose(t1, y_ref[:batch], atol=1e-5), "audio1 mismatch (train)"
    assert jnp.allclose(t2, y_ref[batch:2 * batch], atol=1e-5), "audio2 mismatch (train)"
    assert jnp.allclose(t3, y_ref[2 * batch:], atol=1e-5), "image mismatch (train)"

    print("KERNEL_OK")
</pallas_src>

<mosaic_0001>
module attributes {stable_mosaic.version = 11 : i64} {
  func.func @_disc_eval_kernel(%arg0: memref<8x32xf32, #tpu.memory_space<vmem>>, %arg1: memref<8x32xf32, #tpu.memory_space<vmem>>, %arg2: memref<8x32xf32, #tpu.memory_space<vmem>>, %arg3: memref<32x4xf32, #tpu.memory_space<vmem>>, %arg4: memref<1x4xf32, #tpu.memory_space<vmem>>, %arg5: memref<8x4xf32, #tpu.memory_space<vmem>>, %arg6: memref<8x4xf32, #tpu.memory_space<vmem>>, %arg7: memref<8x4xf32, #tpu.memory_space<vmem>>) attributes {dimension_semantics = [], scalar_prefetch = 0 : i64, scratch_operands = 0 : i64, tpu.core_type = #tpu.core_type<tc>} {
    %c0 = arith.constant 0 : index
    %c0_0 = arith.constant 0 : index
    %0 = vector.load %arg0[%c0, %c0_0] : memref<8x32xf32, #tpu.memory_space<vmem>>, vector<8x32xf32>
    %c0_1 = arith.constant 0 : index
    %c0_2 = arith.constant 0 : index
    %1 = vector.load %arg1[%c0_1, %c0_2] : memref<8x32xf32, #tpu.memory_space<vmem>>, vector<8x32xf32>
    %c0_3 = arith.constant 0 : index
    %c0_4 = arith.constant 0 : index
    %2 = vector.load %arg2[%c0_3, %c0_4] : memref<8x32xf32, #tpu.memory_space<vmem>>, vector<8x32xf32>
    %3 = tpu.concatenate %0, %1, %2 in 0 : vector<8x32xf32>, vector<8x32xf32>, vector<8x32xf32> -> vector<24x32xf32>
    %c0_5 = arith.constant 0 : index
    %c0_6 = arith.constant 0 : index
    %4 = vector.load %arg3[%c0_5, %c0_6] : memref<32x4xf32, #tpu.memory_space<vmem>>, vector<32x4xf32>
    %cst = arith.constant dense<0.000000e+00> : vector<24x4xf32>
    %5 = tpu.matmul %3, %4, %cst {dimension_numbers = #tpu.dot_dimension_numbers<[1], [0], [0], [1], [0, 0, 1, 1], [], []>} : vector<24x32xf32>, vector<32x4xf32>, vector<24x4xf32> -> vector<24x4xf32>
    %c0_7 = arith.constant 0 : index
    %c0_8 = arith.constant 0 : index
    %6 = vector.load %arg4[%c0_7, %c0_8] : memref<1x4xf32, #tpu.memory_space<vmem>>, vector<1x4xf32>
    %7 = vector.broadcast %6 : vector<1x4xf32> to vector<24x4xf32>
    %8 = arith.addf %5, %7 : vector<24x4xf32>
    %9 = vector.extract_strided_slice %8 {offsets = [0, 0], sizes = [8, 4], strides = [1, 1]} : vector<24x4xf32> to vector<8x4xf32>
    %c0_9 = arith.constant 0 : index
    %c0_10 = arith.constant 0 : index
    %10 = vector.load %arg5[%c0_9, %c0_10] : memref<8x4xf32, #tpu.memory_space<vmem>>, vector<8x4xf32>
    tpu.vector_store %arg5[%c0_9, %c0_10], %9 {strides = array<i32>} : memref<8x4xf32, #tpu.memory_space<vmem>>, vector<8x4xf32>,
    %11 = vector.extract_strided_slice %8 {offsets = [8, 0], sizes = [8, 4], strides = [1, 1]} : vector<24x4xf32> to vector<8x4xf32>
    %c0_11 = arith.constant 0 : index
    %c0_12 = arith.constant 0 : index
    %12 = vector.load %arg6[%c0_11, %c0_12] : memref<8x4xf32, #tpu.memory_space<vmem>>, vector<8x4xf32>
    tpu.vector_store %arg6[%c0_11, %c0_12], %11 {strides = array<i32>} : memref<8x4xf32, #tpu.memory_space<vmem>>, vector<8x4xf32>,
    %13 = vector.extract_strided_slice %8 {offsets = [16, 0], sizes = [8, 4], strides = [1, 1]} : vector<24x4xf32> to vector<8x4xf32>
    %c0_13 = arith.constant 0 : index
    %c0_14 = arith.constant 0 : index
    %14 = vector.load %arg7[%c0_13, %c0_14] : memref<8x4xf32, #tpu.memory_space<vmem>>, vector<8x4xf32>
    tpu.vector_store %arg7[%c0_13, %c0_14], %13 {strides = array<i32>} : memref<8x4xf32, #tpu.memory_space<vmem>>, vector<8x4xf32>,
    return
  }
}

</mosaic_0001>

<bundles_post_ra>
// kernel: tpu_custom_call.1
= control target key start
LH: loop header
LB: loop body
LE: loop exit
PB: predicated region body
PF: predicated region fallthrough
CT: control target
= control target key end

     0   :  { %v181_v0 = vmov 0.0   ;;  %vm37_vm0 = vcmask 261120   ;;  %vm182_vm1 = vmmov 0   ;;  %vm127_vm2 = vcmask 31744   ;;  %s256_s3 = inlined_call_operand.vmem [shape: f32[32,4], index: 3, kind: input, shape index: {}]   ;;  %s257_s1 = inlined_call_operand.vmem [shape: f32[8,32], index: 1, kind: input, shape index: {}]   ;;  %s258_s0 = inlined_call_operand.vmem [shape: f32[8,32], index: 0, kind: input, shape index: {}]   ;;  %s259_s2 = inlined_call_operand.vmem [shape: f32[8,32], index: 2, kind: input, shape index: {}]   ;;  %s260_s4 = inlined_call_operand.vmem [shape: f32[1,4], index: 4, kind: input, shape index: {}]   ;;  %s261_s6 = inlined_call_operand.vmem [shape: f32[8,4], index: 6, kind: output, shape index: {1}]   ;;  %s262_s5 = inlined_call_operand.vmem [shape: f32[8,4], index: 5, kind: output, shape index: {0}]   ;;  %s263_s7 = inlined_call_operand.vmem [shape: f32[8,4], index: 7, kind: output, shape index: {2}]  }
   0x1   :  { %171 = vmatprep.subr.mxu1 %v181_v0  ;;  %v29_v1 = vld [vmem:[%s256_s3 + $0x18] sm:$0xff]  ;;  %154 = vmatprep.subr.mxu0 %v181_v0  ;;  %v28_v2 = vld [vmem:[%s256_s3 + $0x10] sm:$0xff]  ;;  %v27_v3 = vld [vmem:[%s256_s3 + $0x8] sm:$0xff] }
   0x2   :  { %175 = vmatpush3.msra.mxu1 %v29_v1  ;;  %155 = vmatpush3.msra.mxu0 %v29_v1  ;;  %v26_v4 = vld [vmem:[%s256_s3] sm:$0xff] }
   0x3   :  { %172 = vmatprep.subr.mxu1 %v181_v0  ;;  %156 = vmatprep.subr.mxu0 %v181_v0  ;;  %v24_v5 = vld [vmem:[%s257_s1] sm:$0xff] }
   0x4   :  { %176 = vmatpush3.msra.mxu1 %v28_v2  ;;  %157 = vmatpush3.msra.mxu0 %v28_v2  ;;  %v23_v6 = vld [vmem:[%s258_s0] sm:$0xff] }
   0x5   :  { %173 = vmatprep.subr.mxu1 %v181_v0  ;;  %158 = vmatprep.subr.mxu0 %v181_v0  ;;  %v25_v7 = vld [vmem:[%s259_s2] sm:$0xff] }
   0x6   :  { %177 = vmatpush3.msra.mxu1 %v27_v3  ;;  %159 = vmatpush3.msra.mxu0 %v27_v3  ;;  %v143_v8 = vld [vmem:[%s260_s4] ss:$0 sm:$0xff] }
   0x7   :  { %174 = vmatprep.subr.mxu1 %v181_v0  ;;  %165 = vmatprep.mubr.msk.f32.mxu1 %vm182_vm1, %v181_v0 }
   0x8   :  { %178 = vmatpush3.msra.mxu1 %v26_v4  ;;  %160 = vmatprep.subr.mxu0 %v181_v0 }
   0x9   :  { %166 = vmatmul.mubr.msk.f32.vlgmr.msra.gmra.mxu1 %vm37_vm0, %v24_v5  ;;  %161 = vmatpush3.msra.mxu0 %v26_v4 }
   0xa   :  { %162 = vmatprep.mubr.msk.f32.mxu0 %vm182_vm1, %v181_v0  ;;  %168 = vmatprep.mubr.msk.f32.mxu1 %vm182_vm1, %v181_v0 }
   0xb   :  { %163 = vmatmul.mubr.msk.f32.vlgmr.msra.gmra.mxu0 %vm37_vm0, %v23_v6 }
   0xd   :  { %169 = vmatmul.mubr.msk.f32.gmra.mxu1 %vm37_vm0, %v25_v7 }
  0xc9   :  { %v118_v9 = vpop.f32.mrf.mxu1 }
  0xca   :  { %v119_v10 = vadd.f32 %v143_v8, %v118_v9 }
  0xcb   :  { %v113_v11 = vpop.f32.mrf.mxu0  ;;  %v167_v12 = vpop.f32.mrf.mxu1 }
  0xcc   :  { %129 = vst.msk [vmem:[%s261_s6] sm:$0xff] %vm127_vm2, %v119_v10  ;;  %v114_v13 = vadd.f32 %v143_v8, %v113_v11 }
  0xcd   :  { %v164_v14 = vpop.f32.mrf.mxu0  ;;  %v123_v15 = vpop.f32.mrf.mxu1 }
  0xce   :  { %128 = vst.msk [vmem:[%s262_s5] sm:$0xff] %vm127_vm2, %v114_v13  ;;  %v124_v16 = vadd.f32 %v143_v8, %v123_v15 }
  0xcf   :  { %v170_v17 = vpop.f32.mrf.mxu1 }
  0xd0   :  { %130 = vst.msk [vmem:[%s263_s7] sm:$0xff] %vm127_vm2, %v124_v16 }

</bundles_post_ra>
